<compile_context>
chip_gen: v7x
topology: tpu7x:2x2x1
jax: 0.10.0
libtpu: 0.0.40
codegen_flags: <defaults>
</compile_context>

<pallas_src>
import functools

import jax
import jax.numpy as jnp
from jax import lax
from jax.experimental import pallas as pl
from jax.experimental.pallas import tpu as pltpu


# --------------------------------------------------------------------------- #
# Tiling helpers
# --------------------------------------------------------------------------- #
def _round_up(x, m):
    return (x + m - 1) // m * m


def _choose_n_tile(C, N, *, max_tile=2048, target_bytes=4 * 1024 * 1024):
    """Lane-dense N tile (multiple of 128) targeting ~target_bytes f32 blocks.

    Larger tiles amortize the ~0.35us per-grid-step overhead; for small C a
    (C, 2048) block is only a few hundred KiB so we go wide.
    """
    per_col = max(C, 8) * 4                      # f32 bytes per N column
    t = (target_bytes // per_col) // 128 * 128
    t = max(128, min(int(t), max_tile))
    t = min(t, _round_up(N, 128))                # never over-pad tiny maps
    return t


def _choose_row_block(C, *, max_rows=256):
    """Pass-1 row block Cb: full C when small, else a divisor matching the MXU."""
    if C <= max_rows:
        return C
    for cb in range(max_rows, 0, -8):
        if C % cb == 0:
            return cb
    return C


def _vmem_limit(needed_bytes):
    """Explicit scoped-VMEM limit: 2x the computed footprint with headroom,
    never below the 32 MiB default, never above v7x physical VMEM (64 MiB)."""
    return int(min(max(2 * needed_bytes, 32 * 1024 * 1024), 64 * 1024 * 1024))


# --------------------------------------------------------------------------- #
# Kernels
# --------------------------------------------------------------------------- #
def _attention_kernel(x_lhs_ref, x_rhs_ref, attn_ref, acc_ref, *, matmul_dtype):
    """Pass 1: accumulate a (Cb, C) energy row-block over N tiles; softmax on
    the last K tile.

      x_lhs_ref : (Cb, TK) row-block of the flattened feature map
      x_rhs_ref : (C,  TK) full-channel tile (same data when Cb == C)
      attn_ref  : (Cb, C)  attention rows, matmul_dtype (resident across K)
      acc_ref   : (Cb, C)  f32 energy accumulator (VMEM scratch)
    """
    k = pl.program_id(2)

    @pl.when(k == 0)
    def _():
        acc_ref[...] = jnp.zeros_like(acc_ref)

    lhs = x_lhs_ref[...].astype(matmul_dtype)
    rhs = x_rhs_ref[...].astype(matmul_dtype)
    # Contract on the last dim of BOTH operands (rows @ X^T): no tile transpose.
    acc_ref[...] += lax.dot_general(
        lhs, rhs,
        dimension_numbers=(((1,), (1,)), ((), ())),
        preferred_element_type=jnp.float32,
    )

    @pl.when(k == pl.num_programs(2) - 1)
    def _():
        energy = acc_ref[...]                               # (Cb, C) f32
        # PyTorch: softmax(rowmax(E) - E).  Softmax is shift-invariant per row,
        # so exp(rowmin(E) - E) / sum(...) is identical, needs one cross-lane
        # reduction, and keeps the largest exponent at exactly 0.
        e = jnp.exp(jnp.min(energy, axis=-1, keepdims=True) - energy)
        # Exact divide (runs once per row-block; approx reciprocal is not worth
        # the accuracy loss here).
        attn = e / jnp.sum(e, axis=-1, keepdims=True)
        attn_ref[...] = attn.astype(attn_ref.dtype)         # single cast to bf16


def _output_kernel(gamma_ref, attn_ref, x_ref, o_ref, *, matmul_dtype):
    """Pass 2: out_tile = gamma * (attention @ x_tile) + x_tile.

    attn_ref already holds matmul_dtype values (cast once in pass 1)."""
    x = x_ref[...]                                          # (C, TN) f32
    out = jnp.dot(attn_ref[...], x.astype(matmul_dtype),
                  preferred_element_type=jnp.float32)       # (C, TN) f32
    o_ref[...] = (gamma_ref[0] * out + x).astype(o_ref.dtype)


def _fused_kernel(gamma_ref, x_ref, o_ref, *, matmul_dtype):
    """Fused single-pass CAM for maps that fit in VMEM: X read from HBM once."""
    x = x_ref[...]                                          # (C, Np) f32
    xm = x.astype(matmul_dtype)
    energy = lax.dot_general(
        xm, xm,
        dimension_numbers=(((1,), (1,)), ((), ())),
        preferred_element_type=jnp.float32,
    )                                                       # (C, C) f32
    e = jnp.exp(jnp.min(energy, axis=-1, keepdims=True) - energy)
    attn = (e / jnp.sum(e, axis=-1, keepdims=True)).astype(matmul_dtype)
    out = jnp.dot(attn, xm, preferred_element_type=jnp.float32)
    o_ref[...] = (gamma_ref[0] * out + x).astype(o_ref.dtype)


# --------------------------------------------------------------------------- #
# Wrapper
# --------------------------------------------------------------------------- #
def cam_module(x, gamma, *, matmul_dtype=jnp.bfloat16, row_block=None,
               n_tile=None, fuse=True, fused_vmem_budget=40 * 1024 * 1024):
    """CAM_Module forward.  x: (B, C, H, W) f32, gamma: (1,) f32 -> (B, C, H, W).

    matmul_dtype=float32 keeps full-precision operands (recommended for very
    large spatial maps where bf16-operand energy drift could matter)."""
    B, C, H, W = x.shape
    N = H * W
    itemsize = jnp.dtype(matmul_dtype).itemsize

    tn = n_tile if n_tile is not None else _choose_n_tile(C, N)
    # Pad the flattened spatial dim up to a multiple of the N tile: lane-dense
    # stores, legal tiling, and no degenerate 128-wide tiles for awkward H*W.
    # Zero padding does not change the energy; padded output columns are
    # sliced off below.
    Np = _round_up(N, tn)
    xf = x.reshape(B, C, N)
    if Np != N:
        xf = jnp.pad(xf, ((0, 0), (0, 0), (0, Np - N)))

    # ---------------- Fused single-pass path (reads X from HBM once) ----------
    fused_bytes = (2 * 2 * C * Np * 4          # x + out blocks, double-buffered
                   + C * Np * itemsize         # matmul_dtype copy of the slab
                   + 4 * C * C * 4)            # energy / attention intermediates
    if fuse and fused_bytes <= fused_vmem_budget:
        out_flat = pl.pallas_call(
            functools.partial(_fused_kernel, matmul_dtype=matmul_dtype),
            out_shape=jax.ShapeDtypeStruct((B, C, Np), x.dtype),
            grid=(B,),
            in_specs=[
                pl.BlockSpec(memory_space=pltpu.MemorySpace.SMEM),           # gamma
                pl.BlockSpec((pl.Squeezed(), C, Np), lambda b: (b, 0, 0)),   # x
            ],
            out_specs=pl.BlockSpec((pl.Squeezed(), C, Np), lambda b: (b, 0, 0)),
            compiler_params=pltpu.CompilerParams(
                dimension_semantics=("parallel",),
                vmem_limit_bytes=_vmem_limit(fused_bytes)),
        )(gamma, xf)
        if Np != N:
            out_flat = out_flat[:, :, :N]
        return out_flat.reshape(B, C, H, W)

    # ---------------- Two-pass tiled path --------------------------------------
    tk = tn
    cb = row_block if row_block is not None else _choose_row_block(C)
    if C % cb:
        cb = C
    n_row_blocks = C // cb

    attn_kernel = functools.partial(_attention_kernel, matmul_dtype=matmul_dtype)
    lhs_spec = pl.BlockSpec((pl.Squeezed(), cb, tk), lambda b, ci, k: (b, ci, k))

    if n_row_blocks == 1:
        # Single row block: feed x once and reuse it for both operands
        # (halves pass-1 input DMA for small C).
        def pass1_kernel(x_ref, attn_ref, acc_ref):
            attn_kernel(x_ref, x_ref, attn_ref, acc_ref)
        in_specs_1 = [lhs_spec]
        args_1 = (xf,)
        pass1_bytes = 2 * cb * tk * 4 + 2 * cb * C * itemsize + cb * C * 4
    else:
        pass1_kernel = attn_kernel
        rhs_spec = pl.BlockSpec((pl.Squeezed(), C, tk), lambda b, ci, k: (b, 0, k))
        in_specs_1 = [lhs_spec, rhs_spec]
        args_1 = (xf, xf)
        pass1_bytes = (2 * (cb + C) * tk * 4 + 2 * cb * C * itemsize
                       + cb * C * 4)

    # Pass 1: attention = softmax(rowmax(E) - E), E accumulated over N tiles.
    # Attention is emitted directly in matmul_dtype (bf16 by default): halves
    # the (B, C, C) HBM writeback/readback and removes the per-tile re-cast.
    attn = pl.pallas_call(
        pass1_kernel,
        out_shape=jax.ShapeDtypeStruct((B, C, C), matmul_dtype),
        grid=(B, n_row_blocks, Np // tk),
        in_specs=in_specs_1,
        out_specs=pl.BlockSpec((pl.Squeezed(), cb, C), lambda b, ci, k: (b, ci, 0)),
        scratch_shapes=[pltpu.VMEM((cb, C), jnp.float32)],
        compiler_params=pltpu.CompilerParams(
            dimension_semantics=("parallel", "parallel", "arbitrary"),
            vmem_limit_bytes=_vmem_limit(pass1_bytes)),
    )(*args_1)

    # Pass 2: out = gamma * (attention @ X) + X, tiled over N.
    pass2_bytes = 2 * 2 * C * tn * 4 + 2 * C * C * itemsize
    out_flat = pl.pallas_call(
        functools.partial(_output_kernel, matmul_dtype=matmul_dtype),
        out_shape=jax.ShapeDtypeStruct((B, C, Np), x.dtype),
        grid=(B, Np // tn),
        in_specs=[
            pl.BlockSpec(memory_space=pltpu.MemorySpace.SMEM),                # gamma
            pl.BlockSpec((pl.Squeezed(), C, C), lambda b, n: (b, 0, 0)),      # attn
            pl.BlockSpec((pl.Squeezed(), C, tn), lambda b, n: (b, 0, n)),     # x
        ],
        out_specs=pl.BlockSpec((pl.Squeezed(), C, tn), lambda b, n: (b, 0, n)),
        compiler_params=pltpu.CompilerParams(
            dimension_semantics=("parallel", "parallel"),
            vmem_limit_bytes=_vmem_limit(pass2_bytes)),
    )(gamma, attn, xf)

    if Np != N:
        out_flat = out_flat[:, :, :N]
    return out_flat.reshape(B, C, H, W)


# --------------------------------------------------------------------------- #
# Pure-JAX reference (mirrors the PyTorch CAM_Module forward)
# --------------------------------------------------------------------------- #
def cam_reference(x, gamma, matmul_dtype=jnp.float32):
    """matmul_dtype applies the same operand casts as the kernel so the bf16
    path can be validated deterministically."""
    B, C, H, W = x.shape
    q = x.reshape(B, C, -1)                                   # (B, C, N) f32
    qm = q.astype(matmul_dtype)
    energy = jnp.einsum("bcn,bdn->bcd", qm, qm,
                        preferred_element_type=jnp.float32)   # (B, C, C)
    e_new = jnp.max(energy, axis=-1, keepdims=True) - energy
    attn = jax.nn.softmax(e_new, axis=-1)
    out = jnp.einsum("bcd,bdn->bcn", attn.astype(matmul_dtype), qm,
                     preferred_element_type=jnp.float32)
    return (gamma[0] * out + q).reshape(B, C, H, W)


# --------------------------------------------------------------------------- #
# Self-test
# --------------------------------------------------------------------------- #
if __name__ == "__main__":
    key = jax.random.PRNGKey(0)
    B, C, H, W = 2, 4, 16, 16
    x = jax.random.normal(key, (B, C, H, W), dtype=jnp.float32)

    gamma0 = jnp.zeros((1,), dtype=jnp.float32)       # module init: gamma = 0
    gamma1 = jnp.full((1,), 0.5, dtype=jnp.float32)   # exercise the attention path

    # 1) gamma = 0 (module init): out == x exactly (validates residual + tiling).
    out = cam_module(x, gamma0)
    jax.block_until_ready(out)
    assert out.shape == (B, C, H, W)
    assert jnp.allclose(out, x, atol=1e-5, rtol=1e-5)

    # 2) Default bf16-operand / f32-accumulate path, fused kernel, against a
    #    reference that applies identical operand casts.
    ref_bf16 = cam_reference(x, gamma1, matmul_dtype=jnp.bfloat16)
    out_fused = cam_module(x, gamma1)
    jax.block_until_ready(out_fused)
    assert jnp.allclose(out_fused, ref_bf16, atol=1e-2, rtol=1e-2)

    # 3) Two-pass tiled path (fuse disabled) on the same inputs.
    out_2pass = cam_module(x, gamma1, fuse=False)
    jax.block_until_ready(out_2pass)
    assert jnp.allclose(out_2pass, ref_bf16, atol=1e-2, rtol=1e-2)

    # 4) Row-tiled pass 1 (Cb < C) exercises the two-operand energy kernel.
    C2 = 16
    x3 = jax.random.normal(jax.random.PRNGKey(1), (B, C2, H, W), dtype=jnp.float32)
    ref3 = cam_reference(x3, gamma1, matmul_dtype=jnp.bfloat16)
    out3 = cam_module(x3, gamma1, fuse=False, row_block=8)
    jax.block_until_ready(out3)
    assert jnp.allclose(out3, ref3, atol=1e-2, rtol=1e-2)

    # 5) Non-multiple-of-128 spatial size exercises the N-padding path.
    x2 = jax.random.normal(jax.random.PRNGKey(2), (2, 4, 10, 10), dtype=jnp.float32)
    ref2 = cam_reference(x2, gamma1, matmul_dtype=jnp.bfloat16)
    out2a = cam_module(x2, gamma1)                 # fused
    out2b = cam_module(x2, gamma1, fuse=False)     # two-pass
    jax.block_until_ready((out2a, out2b))
    assert out2a.shape == x2.shape
    assert jnp.allclose(out2a, ref2, atol=1e-2, rtol=1e-2)
    assert jnp.allclose(out2b, ref2, atol=1e-2, rtol=1e-2)

    # 6) f32-operand path: matmul implementation precision differs between
    #    interpret / Mosaic / XLA-default modes, so only a coarse structural
    #    sanity check is asserted here (the bf16 tests above validate the
    #    algorithm deterministically).
    out_f32 = cam_module(x, gamma1, matmul_dtype=jnp.float32, fuse=False)
    jax.block_until_ready(out_f32)
    assert bool(jnp.all(jnp.isfinite(out_f32)))
    assert jnp.allclose(out_f32, cam_reference(x, gamma1), atol=0.1, rtol=0.1)

    print("KERNEL_OK")
</pallas_src>

<mosaic_0001>
module attributes {stable_mosaic.version = 11 : i64} {
  func.func @_fused_kernel(%arg0: i32, %arg1: memref<1xf32, #tpu.memory_space<smem>>, %arg2: memref<1x4x256xf32, #tpu.memory_space<vmem>>, %arg3: memref<1x4x256xf32, #tpu.memory_space<vmem>>) attributes {dimension_semantics = [#tpu.dimension_semantics<parallel>], iteration_bounds = array<i64: 2>, scalar_prefetch = 0 : i64, scratch_operands = 0 : i64, tpu.core_type = #tpu.core_type<tc>, window_params = [{transform_indices = @transform_0, window_bounds = array<i64: 1>}, {transform_indices = @transform_1, window_bounds = array<i64: 1, 4, 256>}, {transform_indices = @transform_2, window_bounds = array<i64: 1, 4, 256>}]} {
    %c0 = arith.constant 0 : index
    %c0_0 = arith.constant 0 : index
    %c0_1 = arith.constant 0 : index
    %0 = vector.load %arg2[%c0, %c0_0, %c0_1] : memref<1x4x256xf32, #tpu.memory_space<vmem>>, vector<1x4x256xf32>
    %1 = vector.shape_cast %0 : vector<1x4x256xf32> to vector<4x256xf32>
    %2 = arith.truncf %1 : vector<4x256xf32> to vector<4x256xbf16>
    %cst = arith.constant dense<0.000000e+00> : vector<4x4xf32>
    %3 = tpu.matmul %2, %2, %cst {dimension_numbers = #tpu.dot_dimension_numbers<[1], [1], [0], [0], [0, 0, 1, 0], [], []>} : vector<4x256xbf16>, vector<4x256xbf16>, vector<4x4xf32> -> vector<4x4xf32>
    %cst_2 = arith.constant dense<0x7F800000> : vector<4xf32>
    %4 = vector.multi_reduction <minimumf>, %3, %cst_2 [1] : vector<4x4xf32> to vector<4xf32>
    %5 = vector.shape_cast %4 : vector<4xf32> to vector<4x1xf32>
    %6 = vector.broadcast %5 : vector<4x1xf32> to vector<4x4xf32>
    %7 = arith.subf %6, %3 : vector<4x4xf32>
    %8 = math.exp %7 : vector<4x4xf32>
    %cst_3 = arith.constant dense<0.000000e+00> : vector<4xf32>
    %9 = vector.multi_reduction <add>, %8, %cst_3 [1] : vector<4x4xf32> to vector<4xf32>
    %10 = vector.shape_cast %9 : vector<4xf32> to vector<4x1xf32>
    %11 = vector.broadcast %10 : vector<4x1xf32> to vector<4x4xf32>
    %12 = arith.divf %8, %11 : vector<4x4xf32>
    %13 = arith.truncf %12 : vector<4x4xf32> to vector<4x4xbf16>
    %cst_4 = arith.constant dense<0.000000e+00> : vector<4x256xf32>
    %14 = tpu.matmul %13, %2, %cst_4 {dimension_numbers = #tpu.dot_dimension_numbers<[1], [0], [0], [1], [0, 0, 1, 1], [], []>} : vector<4x4xbf16>, vector<4x256xbf16>, vector<4x256xf32> -> vector<4x256xf32>
    %c0_5 = arith.constant 0 : index
    %15 = memref.load %arg1[%c0_5] : memref<1xf32, #tpu.memory_space<smem>>
    %16 = vector.broadcast %15 : f32 to vector<4x256xf32>
    %17 = arith.mulf %16, %14 : vector<4x256xf32>
    %18 = arith.addf %17, %1 : vector<4x256xf32>
    %c0_6 = arith.constant 0 : index
    %c0_7 = arith.constant 0 : index
    %c0_8 = arith.constant 0 : index
    %19 = vector.load %arg3[%c0_6, %c0_7, %c0_8] : memref<1x4x256xf32, #tpu.memory_space<vmem>>, vector<1x4x256xf32>
    %20 = vector.shape_cast %19 : vector<1x4x256xf32> to vector<4x256xf32>
    %21 = vector.shape_cast %18 : vector<4x256xf32> to vector<1x4x256xf32>
    tpu.vector_store %arg3[%c0_6, %c0_7, %c0_8], %21 {strides = array<i32>} : memref<1x4x256xf32, #tpu.memory_space<vmem>>, vector<1x4x256xf32>,
    return
  }
  func.func @transform_0(%arg0: i32) -> i32 {
    %c0_i32 = arith.constant 0 : i32
    %c0_i32_0 = arith.constant 0 : i32
    return %c0_i32 : i32
  }
  func.func @transform_1(%arg0: i32) -> (i32, i32, i32) {
    %c0_i32 = arith.constant 0 : i32
    %c0_i32_0 = arith.constant 0 : i32
    %c0_i32_1 = arith.constant 0 : i32
    return %arg0, %c0_i32, %c0_i32_0 : i32, i32, i32
  }
  func.func @transform_2(%arg0: i32) -> (i32, i32, i32) {
    %c0_i32 = arith.constant 0 : i32
    %c0_i32_0 = arith.constant 0 : i32
    %c0_i32_1 = arith.constant 0 : i32
    return %arg0, %c0_i32, %c0_i32_0 : i32, i32, i32
  }
}

</mosaic_0001>

<bundles_post_ra>
// kernel: tpu_custom_call.1
= control target key start
LH: loop header
LB: loop body
LE: loop exit
PB: predicated region body
PF: predicated region fallthrough
CT: control target
= control target key end

     0   :  { %s723_s0 = inlined_call_operand.<no memory space> [shape: f32[1], index: 0, kind: input, shape index: {}]   ;;  %s724_s1 = inlined_call_operand.hbm [shape: f32[2,4,256], index: 1, kind: input, shape index: {}]   ;;  %s725_s2 = inlined_call_operand.hbm [shape: f32[2,4,256], index: 2, kind: output, shape index: {}]  }
   0x1   :  { %7 = sst [smem:[#allocation2]] %s723_s0 }
   0x2   :  { %8 = vsyncpa [#allocation4], 0 }
   0x3   :  { %10 = vsyncpa [#allocation4 + $0x1], 0 }
   0x4   :  { %11 = vsyncpa [#allocation5], 0 }
   0x5   :  { %13 = vsyncpa [#allocation5 + $0x1], 0  ;;  %s558_s11 = smov 0   ;;  %s560_s12 = smov 0  }
   0x6   :  { %s562_s13 = smov 0   ;;  %s564_s14 = smov 0  }
   0x7 LB: > { %s579_s0 = sadd.s32 4294967295, %s535_s14   ;;  %s369_s15 = sadd.s32 4294967294, %s535_s14   ;;  %s535_s14 = sphi %s564_s14, %s740_s14   ;;  %s531_s13 = sphi %s562_s13, %s739_s13   ;;  %s527_s12 = sphi %s560_s12, %s738_s12   ;;  %s523_s11 = sphi %s558_s11, %s737_s11  }
   0x8   : > { %s583_s16 = sadd.s32 1, %s535_s14   ;;  %s47_s17 = sadd.s32 1, %s531_s13 }
   0x9   : > { %s44_s18 = ssub.s32 %s535_s14, %s583_s16  ;;  %p54_p0 = scmp.ne.s32.totalorder %s531_s13, %s527_s12 }
   0xa   : > { %p45_p1 = scmp.eq.s32.totalorder %s44_s18, 0  ;;  %p55_p2 = scmp.eq.s32.totalorder %s535_s14, 0 }
   0xb   : > { %p60_p3 = scmp.ne.s32.totalorder %s527_s12, %s523_s11  ;;  %p61_p4 = scmp.eq.s32.totalorder %s579_s0, 0 }
   0xc   : > { %s595_s19 = scalar_select %p45_p1, %s531_s13, %s47_s17  }
   0xd   : > { %p597_p5 = por %p55_p2, %p54_p0  ;;  %p601_p6 = por %p61_p4, %p60_p3 }
   0xe   : > { %p84_p7 = scmp.eq.s32.totalorder %s579_s0, 1  ;;  %p90_p8 = scmp.eq.s32.totalorder %s369_s15, 1 }
   0xf   : > { %p399_p10 = scmp.lt.s32.totalorder %s535_s14, 2  ;;  %s113_s24 = sand.u32 1, %s531_s13  }
  0x10   : > { %p608_p11 = por %p84_p7, %p54_p0  ;;  %p612_p12 = por %p90_p8, %p60_p3 }
  0x11   : > { %s385_s25 = sshll.u32 %s535_s14, 7  ;;  %s372_s26 = sshll.u32 %s113_s24, 3 }
  0x12   : > { %s729_s22 = scalar_select %p608_p11, 1, 0 }
  0x13   : > { %s730_s23 = scalar_select %p612_p12, 1, 0 }
  0x14   : > { %s621_s29 = scalar_lea.hbm %s724_s1, %s385_s25  ;;  %s117_s30 = scalar_lea.vmem [#allocation3], %s372_s26 }
  0x15   : > { %s125_s3 = sshll.u32 %s117_s30, 4  ;;  %p625_p13 = pnand %p399_p10, %p597_p5  ;;  %s629_s3 = int_to_ptr.vmem [resolvable:$true] %s125_s3 }
  0x16   : > { %s114_s5 = scalar_lea.sflag [#allocation4], %s113_s24  ;;  %s439_s6 = scalar_lea.hbm %s621_s29, 128 }
  0x17   : > { %p440_p2 = scmp.ne.s32.totalorder %s621_s29, %s439_s6  ;;  %p441_p3 = pneg %p625_p13 }
  0x18   : > { %s444_s9 = scalar_lea.hbm %s724_s1, 256  ;;  %p445_p5 = scmp.lt.u32.totalorder %s621_s29, %s724_s1 }
  0x19   : > { %p442_p4 = pnand %p441_p3, %p440_p2  ;;  %p446_p8 = scmp.lt.u32.totalorder %s444_s9, %s439_s6 }
  0x1a   : > { %p448_p9 = scmp.lt.u32.totalorder %s439_s6, %s621_s29 }
  0x1b   : > { %p443_p7 = pneg %p442_p4  ;;  %p447_p10 = por %p446_p8, %p445_p5 }
  0x1d   : > { %p449_p0 = por %p448_p9, %p447_p10 }
  0x1f   : > { %p450_p1 = pnand %p449_p0, %p443_p7 }
  0x21   : > { %453 = shalt.err (!%p450_p1)
}
  0x22   : > { %s454_s17 = scalar_lea.vmem %s629_s3, 128  ;;  %s537_s18 = smov [#allocation3]  }
  0x23   : > { %p455_p2 = scmp.ne.s32.totalorder %s629_s3, %s454_s17  ;;  %s459_s20 = sshll.u32 %s537_s18, 4  ;;  %s460_s20 = int_to_ptr.vmem [resolvable:$false] %s459_s20 }
  0x24   : > { %s461_s24 = scalar_lea.vmem %s460_s20, 256  ;;  %p462_p11 = scmp.lt.s32.totalorder %s629_s3, %s460_s20 }
  0x25   : > { %p457_p4 = pnand %p455_p2, %p441_p3  ;;  %p463_p5 = scmp.lt.s32.totalorder %s461_s24, %s454_s17 }
  0x27   : > { %p458_p12 = pneg %p457_p4  ;;  %p464_p8 = por %p463_p5, %p462_p11 }
  0x29   : > { %p465_p9 = pnand %p464_p8, %p458_p12 }
  0x2b   : > { %468 = shalt.err (!%p465_p9)
}
  0x2c   : > { %394 = dma.hbm_to_vmem [thread:$0]  (!%p625_p13), %s621_s29, 128, %s629_s3, %s114_s5  }
  0x2d   : > { %p732_p0 = scmp.lt.s32.totalorder %s535_s14, 3  ;;  %p733_p1 = scmp.ge.s32.totalorder %s535_s14, 1 }
  0x2f   : > { %p131_p3 = pnand %p733_p1, %p732_p0 }
  0x30   : > { %s663_s25 = sand.u32 (!%p131_p3), 1, %s527_s12  }
  0x31   : > { %134 = sbr.rel (%p131_p3) target bundleno = 831 (0x33f), region = 28  ;;  %s376_s26 = sshll.u32 (!%p131_p3), %s663_s25, 3 }
  0x32   : > { %s137_s27 = scalar_lea.sflag (!%p131_p3), [#allocation4], %s663_s25  ;;  %s140_s28 = scalar_lea.vmem (!%p131_p3), [#allocation3], %s376_s26 }
  0x38   : > { %514 = dma.done.wait (%p601_p6), %s137_s27, 128  }
  0x39   : > { %516 = vsyncadd (%p601_p6), %s137_s27, 4294967168  ;;  %v162_v0 = vld [vmem:[%s140_s28] sm:$0xff]  ;;  %vm208_vm0 = vcmask 27648   ;;  %vm225_vm1 = vcmask 1041408   ;;  %v538_v15 = vmov 0   ;;  %vm221_vm2 = vcmask 31744  }
  0x3a   : > { %v164_v1 = vcombine.high %v162_v0, %v162_v0  ;;  %v166_v2 = vpack.c.bf16 %v162_v0, %v162_v0  ;;  %264 = vmatprep.mubr.bf16.mxu1 %v538_v15  ;;  %s273_s21 = sld [smem:[#allocation2]]  ;;  %s386_s29 = sshll.u32 %s579_s0, 7 }
  0x3b   : > { %s160_s30 = scalar_lea.vmem [#allocation6], %s376_s26  ;;  %s679_s6 = scalar_lea.hbm %s725_s2, %s386_s29 }
  0x3c   : > { %v167_v3 = vpack.c.bf16 %v164_v1, %v164_v1  ;;  %v227_v14 = vsel %vm225_vm1, %v166_v2, 0  ;;  %s299_s3 = sshll.u32 %s160_s30, 4  ;;  %s285_s7 = scalar_lea.sflag [#allocation5], %s663_s25  ;;  %s681_s3 = int_to_ptr.vmem [resolvable:$true] %s299_s3 }
  0x3d   : > { %s469_s8 = scalar_lea.vmem %s681_s3, 128  ;;  %p734_p11 = scmp.ne.s32.totalorder %s729_s22, 0 }
  0x3e   : > { %168 = vmatprep.subr.bf16.mxu0 %v167_v3  ;;  %200 = vmatprep.mubr.bf16.mxu0 %v167_v3  ;;  %p470_p6 = scmp.ne.s32.totalorder %s681_s3, %s469_s8  ;;  %s539_s0 = smov [#allocation6]  }
  0x3f   : > { %169 = vmatpush1.bf16.xpose.msra.mxu0 %v166_v2  ;;  %378 = vmatprep.subr.msk.bf16.mxu1 %vm225_vm1, %v167_v3  ;;  %s473_s9 = sshll.u32 %s539_s0, 4  ;;  %s474_s9 = int_to_ptr.vmem [resolvable:$false] %s473_s9 }
  0x40   : > { %233 = vmatpush1.bf16.msra.mxu1 %v227_v14  ;;  %v274_v20 = vstv %s273_s21  ;;  %p471_p12 = pnand %p470_p6, %p734_p11  ;;  %s475_s10 = scalar_lea.vmem %s474_s9, 256 }
  0x41   : > { %p476_p7 = scmp.lt.s32.totalorder %s681_s3, %s474_s9  ;;  %p477_p10 = scmp.lt.s32.totalorder %s475_s10, %s469_s8 }
  0x42   : > { %p472_p13 = pneg %p471_p12 }
  0x43   : > { %p478_p2 = por %p477_p10, %p476_p7 }
  0x45   : > { %p479_p4 = pnand %p478_p2, %p472_p13 }
  0x46   : > { %201 = vmatmul.mubr.bf16.vlgmr.msra.gmra.mrb[0].mxu0 %v166_v2 }
 0x119   : > { %v202_v4 = vpop.f32.mrb[0].mxu0 }
 0x11a   : > { %v204_v5 = vpop.f32.mrb[1].mxu0  ;;  %v209_v6 = vsel %vm208_vm0, %v202_v4, inf }
 0x11b   : > { %210 = vmin.xlane.f32.xlu0 %v209_v6  ;;  %v205_v7 = vpop.f32.mrb[2].mxu0 }
 0x11c   : > { %v206_v8 = vpop.f32.mrb[3].mxu0 }
 0x1a8   : > { %v211_v9 = vpop.xlane.xlu0 %210 }
 0x1a9   : > { %v212_v10 = vsub.f32 %v211_v9, %v202_v4 }
 0x1ab   : > { %v213_v11 = vmul.f32 1.442695, %v212_v10 }
 0x1ad   : > { %435 = vpow2.f32 %v213_v11 }
 0x1b7   : > { %v436_v12 = vpop.eup %435 }
 0x1b8   : > { %v215_v13 = vsel %vm208_vm0, %v436_v12, 0.0 }
 0x1b9   : > { %216 = vadd.xlane.f32.xlu0 %v215_v13 }
 0x246   : > { %v217_v16 = vpop.xlane.xlu0 %216 }
 0x247   : > { %437 = vrcp.f32 %v217_v16 }
 0x251   : > { %v438_v17 = vpop.eup %437 }
 0x252   : > { %v219_v18 = vmul.f32 %v438_v17, %v436_v12 }
 0x254   : > { %v220_v19 = vpack.c.bf16 %v219_v18, %v219_v18 }
 0x256   : > { %379 = vmatmul.mubr.msk.bf16.vlgmr.msra.gmra.mrb[0].mxu1 %vm221_vm2, %v220_v19 }
 0x329   : > { %v266_v21 = vpop.f32.mrb[0].mxu1 }
 0x32a   : > { %v275_v22 = vmul.f32 %v274_v20, %v266_v21  ;;  %v268_v23 = vpop.f32.mrb[1].mxu1 }
 0x32b   : > { %v276_v24 = vmul.f32 %v274_v20, %v268_v23  ;;  %v270_v25 = vpop.f32.mrb[2].mxu1 }
 0x32c   : > { %v277_v26 = vadd.f32 %v275_v22, %v162_v0  ;;  %v271_v27 = vpop.f32.mrb[3].mxu1 }
 0x32d   : > { %v278_v28 = vadd.f32 %v276_v24, %v164_v1 }
 0x32f   : > { %v281_v29 = vcombine.low %v277_v26, %v278_v28 }
 0x331   : > { %283 = vst [vmem:[%s160_s30] sm:$0xff] %v281_v29 }
 0x332   : > { %482 = shalt.err (!%p479_p4)
}
 0x333   : > { %s483_s15 = scalar_lea.hbm %s679_s6, 128  ;;  %s487_s20 = scalar_lea.hbm %s725_s2, 256 }
 0x334   : > { %p484_p5 = scmp.ne.s32.totalorder %s679_s6, %s483_s15  ;;  %p488_p0 = scmp.lt.u32.totalorder %s679_s6, %s725_s2 }
 0x335   : > { %p489_p1 = scmp.lt.u32.totalorder %s487_s20, %s483_s15  ;;  %p491_p6 = scmp.lt.u32.totalorder %s483_s15, %s679_s6 }
 0x336   : > { %p485_p8 = pnand %p484_p5, %p734_p11 }
 0x337   : > { %p490_p3 = por %p489_p1, %p488_p0 }
 0x338   : > { %p486_p9 = pneg %p485_p8 }
 0x339   : > { %p492_p12 = por %p491_p6, %p490_p3 }
 0x33b   : > { %p493_p13 = pnand %p492_p12, %p486_p9 }
 0x33d   : > { %496 = shalt.err (!%p493_p13)
}
 0x33e   : > { %389 = dma.vmem_to_hbm [thread:$0]  (%p734_p11), %s681_s3, 128, %s679_s6, %s285_s7  }
 0x33f PF: > { %s311_s26 = sand.u32 1, %s523_s11   ;;  %p735_p7 = scmp.ne.s32.totalorder %s730_s23, 0 }
 0x340   : > { %p736_p10 = scmp.ge.s32.totalorder %s535_s14, 2  ;;  %s312_s27 = scalar_lea.sflag [#allocation5], %s311_s26 }
 0x342   : > { %p396_p2 = pnand %p736_p10, %p735_p7 }
 0x344   : > { %518 = dma.done.wait (!%p396_p2), %s312_s27, 128  }
 0x345   : > { %520 = vsyncadd (!%p396_p2), %s312_s27, 4294967168  ;;  %p16_p4 = scmp.ge.s32.totalorder %s583_s16, 4   ;;  %s737_s11 = smov %s527_s12 }
 0x346   : > { %s738_s12 = smov %s531_s13  ;;  %s739_s13 = smov %s595_s19 }
 0x347   : > { %s740_s14 = smov %s583_s16  ;;  %18 = sbr.rel (!%p16_p4) target bundleno = 7 (0x7), region = 73 }
 0x34e   :  { %317 = vsyncpa [#allocation4], 1 }
 0x34f   :  { %319 = vsyncpa [#allocation4 + $0x1], 1 }
 0x350   :  { %320 = vsyncpa [#allocation5], 1 }
 0x351   :  { %322 = vsyncpa [#allocation5 + $0x1], 1 }

</bundles_post_ra>
